<compile_context>
chip_gen: v6e
topology: v6e:2x2x1
jax: 0.10.0
libtpu: 0.0.40
codegen_flags: <defaults>
</compile_context>

<pallas_src>
import jax
import jax.numpy as jnp
from jax.experimental import pallas as pl
from jax.experimental.pallas import tpu as pltpu


def _focal_factor(one_minus_pt, gamma):
    """(1 - pt) ** gamma, using cheap VPU multiplies for small integer gamma."""
    g = float(gamma)
    if g.is_integer() and 0.0 < g <= 8.0:
        f = one_minus_pt
        for _ in range(int(g) - 1):
            f = f * one_minus_pt
        return f
    return jnp.power(one_minus_pt, g)  # generic fallback (EUP)


def _make_focal_kernel(n_valid, tile_n, gamma, size_average, has_alpha):
    inv_n = 1.0 / float(n_valid)
    needs_mask = (n_valid % tile_n) != 0

    def kernel(*refs):
        if has_alpha:
            x_ref, t_ref, a_ref, o_ref, acc_ref = refs
        else:
            x_ref, t_ref, o_ref, acc_ref = refs
            a_ref = None

        i = pl.program_id(0)

        @pl.when(i == 0)
        def _init():
            acc_ref[0, 0] = jnp.float32(0.0)

        # Load native-dtype tile; cast on the VPU (keeps HBM traffic at input width).
        x = x_ref[...].astype(jnp.float32)          # (tile_n, C)
        t = t_ref[...]                              # (tile_n, 1) int32

        # One-hot via lane-iota compare (no gather on TPU).
        col = jax.lax.broadcasted_iota(jnp.int32, x.shape, 1)
        onehot = (col == t).astype(jnp.float32)     # (tile_n, C)

        # log-softmax along the class axis.  Raw logits are unbounded, so the
        # max subtraction IS required for stability here (do not remove).
        m = jnp.max(x, axis=-1, keepdims=True)                       # (tile_n, 1)
        z = x - m
        lse = jnp.log(jnp.sum(jnp.exp(z), axis=-1, keepdims=True))   # (tile_n, 1)
        x_t = jnp.sum(x * onehot, axis=-1, keepdims=True)            # target logit
        logpt = (x_t - m) - lse                                      # (tile_n, 1)

        factor = None
        if float(gamma) != 0.0:
            pt = jnp.exp(logpt)                  # pt uses the UNscaled logpt
            factor = _focal_factor(1.0 - pt, gamma)

        scaled_logpt = logpt
        if has_alpha:
            a = a_ref[...].astype(jnp.float32)                        # (1, C)
            at = jnp.sum(a * onehot, axis=-1, keepdims=True)          # alpha[target]
            scaled_logpt = scaled_logpt * at

        loss = -scaled_logpt if factor is None else -(factor * scaled_logpt)

        if needs_mask:
            # Zero out rows belonging to the zero-padded tail tile.
            row = jax.lax.broadcasted_iota(jnp.int32, loss.shape, 0) + i * tile_n
            loss = jnp.where(row < n_valid, loss, 0.0)

        acc_ref[0, 0] += jnp.sum(loss)

        @pl.when(i == pl.num_programs(0) - 1)
        def _finalize():
            total = acc_ref[0, 0]
            o_ref[0, 0] = total * jnp.float32(inv_n) if size_average else total

    return kernel


def focal_loss(logits, target, gamma=2.0, alpha=None, size_average=True, tile_n=None):
    """Pallas TPU port of FocalLoss.forward. Returns a scalar float32 loss."""
    x = logits
    if x.ndim > 2:
        n0, c = x.shape[0], x.shape[1]
        x = x.reshape(n0, c, -1)                              # (N, C, S)
        x = jnp.transpose(x, (0, 2, 1)).reshape(-1, c)        # (N*S, C)
    n_rows, n_cls = x.shape
    t = target.reshape(-1).astype(jnp.int32)

    alpha_vec = None
    if alpha is not None:
        if isinstance(alpha, (float, int)):
            alpha_vec = jnp.asarray([alpha, 1.0 - alpha], dtype=jnp.float32)
        else:
            alpha_vec = jnp.asarray(alpha, dtype=jnp.float32)
        assert alpha_vec.shape[0] == n_cls, "alpha needs one weight per class"
        alpha_vec = alpha_vec.reshape(1, n_cls)

    # Tile size: multiple of 8 rows, logits tile kept around ~2 MiB so the
    # double-buffered pipeline fits every chip's scoped VMEM (v5e/v6e/v7x).
    if tile_n is None:
        budget = 2 * 1024 * 1024
        tile_n = budget // max(n_cls * x.dtype.itemsize, 1)
    tile_n = min(max(int(tile_n), 8), 1024)
    tile_n = min(tile_n, pl.cdiv(n_rows, 8) * 8)
    tile_n = max(8, (tile_n // 8) * 8)

    num_tiles = pl.cdiv(n_rows, tile_n)
    n_pad = num_tiles * tile_n
    if n_pad != n_rows:
        x = jnp.pad(x, ((0, n_pad - n_rows), (0, 0)))
        t = jnp.pad(t, (0, n_pad - n_rows))
    t2 = t.reshape(n_pad, 1)

    kernel = _make_focal_kernel(n_rows, tile_n, gamma, size_average,
                                alpha_vec is not None)

    in_specs = [
        pl.BlockSpec((tile_n, n_cls), lambda i: (i, 0)),
        pl.BlockSpec((tile_n, 1), lambda i: (i, 0)),
    ]
    inputs = [x, t2]
    if alpha_vec is not None:
        in_specs.append(pl.BlockSpec((1, n_cls), lambda i: (0, 0)))
        inputs.append(alpha_vec)

    out = pl.pallas_call(
        kernel,
        out_shape=jax.ShapeDtypeStruct((1, 1), jnp.float32),
        grid=(num_tiles,),
        in_specs=in_specs,
        out_specs=pl.BlockSpec(memory_space=pltpu.MemorySpace.SMEM),
        scratch_shapes=[pltpu.SMEM((1, 1), jnp.float32)],
        compiler_params=pltpu.CompilerParams(
            dimension_semantics=("arbitrary",),
        ),
    )(*inputs)
    return out[0, 0]


def _reference_focal_loss(logits, target, gamma=2.0, alpha=None, size_average=True):
    """Pure-JAX reference matching the PyTorch module."""
    x = logits
    if x.ndim > 2:
        n0, c = x.shape[0], x.shape[1]
        x = x.reshape(n0, c, -1)
        x = jnp.transpose(x, (0, 2, 1)).reshape(-1, c)
    t = target.reshape(-1).astype(jnp.int32)
    logp = jax.nn.log_softmax(x.astype(jnp.float32), axis=-1)
    logpt = jnp.take_along_axis(logp, t[:, None], axis=-1)[:, 0]
    pt = jnp.exp(logpt)
    if alpha is not None:
        a = jnp.asarray(alpha, jnp.float32)
        logpt = logpt * a[t]
    loss = -((1.0 - pt) ** gamma) * logpt
    return loss.mean() if size_average else loss.sum()


if __name__ == "__main__":
    key = jax.random.PRNGKey(0)
    kx, kt = jax.random.split(key)

    # (batch=2, classes=4, 16x16 spatial) -> flattened to (512, 4) inside the
    # wrapper, exactly like the module's view/transpose/contiguous-view path.
    B, C, H, W = 2, 4, 16, 16
    logits = jax.random.normal(kx, (B, C, H, W), dtype=jnp.float32)
    target = jax.random.randint(kt, (B, H, W), 0, C, dtype=jnp.int32)

    gamma = 2.0
    # tile_n=128 -> 4 batch tiles: exercises the init/accumulate/finalize path.
    loss = focal_loss(logits, target, gamma=gamma, alpha=None,
                      size_average=True, tile_n=128)
    jax.block_until_ready(loss)

    ref = _reference_focal_loss(logits, target, gamma=gamma)
    assert loss.shape == () and bool(jnp.isfinite(loss))
    assert bool(jnp.allclose(loss, ref, rtol=1e-5, atol=1e-6)), (loss, ref)
    print("KERNEL_OK")
</pallas_src>

<mosaic_0001>
module attributes {stable_mosaic.version = 11 : i64} {
  func.func @kernel(%arg0: i32, %arg1: memref<128x4xf32, #tpu.memory_space<vmem>>, %arg2: memref<128x1xi32, #tpu.memory_space<vmem>>, %arg3: memref<1x1xf32, #tpu.memory_space<smem>>, %arg4: memref<1x1xf32, #tpu.memory_space<smem>>) attributes {dimension_semantics = [#tpu.dimension_semantics<arbitrary>], iteration_bounds = array<i64: 4>, scalar_prefetch = 0 : i64, scratch_operands = 1 : i64, tpu.core_type = #tpu.core_type<tc>, window_params = [{transform_indices = @transform_0, window_bounds = array<i64: 128, 4>}, {transform_indices = @transform_1, window_bounds = array<i64: 128, 1>}, {transform_indices = @transform_2, window_bounds = array<i64: 1, 1>}]} {
    %c0_i32 = arith.constant 0 : i32
    %0 = arith.cmpi eq, %arg0, %c0_i32 : i32
    %1 = arith.extui %0 : i1 to i32
    %c0_i32_0 = arith.constant 0 : i32
    %2 = arith.cmpi ne, %1, %c0_i32_0 : i32
    scf.if %2 {
      %cst_14 = arith.constant 0.000000e+00 : f32
      %c0_15 = arith.constant 0 : index
      %c0_16 = arith.constant 0 : index
      %40 = memref.load %arg4[%c0_15, %c0_16] : memref<1x1xf32, #tpu.memory_space<smem>>
      memref.store %cst_14, %arg4[%c0_15, %c0_16] : memref<1x1xf32, #tpu.memory_space<smem>>
    } else {
    }
    %c0 = arith.constant 0 : index
    %c0_1 = arith.constant 0 : index
    %3 = vector.load %arg1[%c0, %c0_1] : memref<128x4xf32, #tpu.memory_space<vmem>>, vector<128x4xf32>
    %c0_2 = arith.constant 0 : index
    %c0_3 = arith.constant 0 : index
    %4 = vector.load %arg2[%c0_2, %c0_3] : memref<128x1xi32, #tpu.memory_space<vmem>>, vector<128x1xi32>
    %5 = tpu.iota {dimensions = array<i32: 1>} : vector<128x4xi32>
    %6 = vector.broadcast %4 : vector<128x1xi32> to vector<128x4xi32>
    %7 = arith.cmpi eq, %5, %6 : vector<128x4xi32>
    %8 = arith.extui %7 : vector<128x4xi1> to vector<128x4xi32>
    %9 = arith.sitofp %8 : vector<128x4xi32> to vector<128x4xf32>
    %cst = arith.constant dense<0xFF800000> : vector<128xf32>
    %10 = vector.multi_reduction <maximumf>, %3, %cst [1] : vector<128x4xf32> to vector<128xf32>
    %11 = vector.shape_cast %10 : vector<128xf32> to vector<128x1xf32>
    %12 = vector.broadcast %11 : vector<128x1xf32> to vector<128x4xf32>
    %13 = arith.subf %3, %12 : vector<128x4xf32>
    %14 = math.exp %13 : vector<128x4xf32>
    %cst_4 = arith.constant dense<0.000000e+00> : vector<128xf32>
    %15 = vector.multi_reduction <add>, %14, %cst_4 [1] : vector<128x4xf32> to vector<128xf32>
    %16 = vector.shape_cast %15 : vector<128xf32> to vector<128x1xf32>
    %17 = math.log %16 : vector<128x1xf32>
    %18 = arith.mulf %3, %9 : vector<128x4xf32>
    %cst_5 = arith.constant dense<0.000000e+00> : vector<128xf32>
    %19 = vector.multi_reduction <add>, %18, %cst_5 [1] : vector<128x4xf32> to vector<128xf32>
    %20 = vector.shape_cast %19 : vector<128xf32> to vector<128x1xf32>
    %21 = arith.subf %20, %11 : vector<128x1xf32>
    %22 = arith.subf %21, %17 : vector<128x1xf32>
    %23 = math.exp %22 : vector<128x1xf32>
    %cst_6 = arith.constant 1.000000e+00 : f32
    %24 = vector.broadcast %cst_6 : f32 to vector<128x1xf32>
    %25 = arith.subf %24, %23 : vector<128x1xf32>
    %26 = arith.mulf %25, %25 : vector<128x1xf32>
    %27 = arith.mulf %26, %22 : vector<128x1xf32>
    %cst_7 = arith.constant 0.000000e+00 : f32
    %28 = vector.broadcast %cst_7 : f32 to vector<128x1xf32>
    %29 = arith.subf %28, %27 : vector<128x1xf32>
    %c0_8 = arith.constant 0 : index
    %c0_9 = arith.constant 0 : index
    %30 = memref.load %arg4[%c0_8, %c0_9] : memref<1x1xf32, #tpu.memory_space<smem>>
    %31 = vector.shape_cast %29 : vector<128x1xf32> to vector<1x128x1xf32>
    %cst_10 = arith.constant dense<0.000000e+00> : vector<1xf32>
    %32 = vector.multi_reduction <add>, %31, %cst_10 [1, 2] : vector<1x128x1xf32> to vector<1xf32>
    %33 = vector.shape_cast %32 : vector<1xf32> to vector<1x1x1xf32>
    %34 = vector.extract %33[0, 0, 0] : f32 from vector<1x1x1xf32>
    %35 = arith.addf %30, %34 : f32
    %c0_11 = arith.constant 0 : index
    %c0_12 = arith.constant 0 : index
    %36 = memref.load %arg4[%c0_11, %c0_12] : memref<1x1xf32, #tpu.memory_space<smem>>
    memref.store %35, %arg4[%c0_11, %c0_12] : memref<1x1xf32, #tpu.memory_space<smem>>
    %c3_i32 = arith.constant 3 : i32
    %37 = arith.cmpi eq, %arg0, %c3_i32 : i32
    %38 = arith.extui %37 : i1 to i32
    %c0_i32_13 = arith.constant 0 : i32
    %39 = arith.cmpi ne, %38, %c0_i32_13 : i32
    scf.if %39 {
      %c0_14 = arith.constant 0 : index
      %c0_15 = arith.constant 0 : index
      %40 = memref.load %arg4[%c0_14, %c0_15] : memref<1x1xf32, #tpu.memory_space<smem>>
      %cst_16 = arith.constant 0.001953125 : f32
      %41 = arith.mulf %40, %cst_16 : f32
      %c0_17 = arith.constant 0 : index
      %c0_18 = arith.constant 0 : index
      %42 = memref.load %arg3[%c0_17, %c0_18] : memref<1x1xf32, #tpu.memory_space<smem>>
      memref.store %41, %arg3[%c0_17, %c0_18] : memref<1x1xf32, #tpu.memory_space<smem>>
    } else {
    }
    return
  }
  func.func @transform_0(%arg0: i32) -> (i32, i32) {
    %c0_i32 = arith.constant 0 : i32
    %c0_i32_0 = arith.constant 0 : i32
    return %arg0, %c0_i32 : i32, i32
  }
  func.func @transform_1(%arg0: i32) -> (i32, i32) {
    %c0_i32 = arith.constant 0 : i32
    %c0_i32_0 = arith.constant 0 : i32
    return %arg0, %c0_i32 : i32, i32
  }
  func.func @transform_2(%arg0: i32) -> (i32, i32) {
    %c0_i32 = arith.constant 0 : i32
    %c0_i32_0 = arith.constant 0 : i32
    %c0_i32_1 = arith.constant 0 : i32
    return %c0_i32, %c0_i32_0 : i32, i32
  }
}

</mosaic_0001>

<bundles_post_ra>
// kernel: tpu_custom_call.1
= control target key start
LH: loop header
LB: loop body
LE: loop exit
PB: predicated region body
PF: predicated region fallthrough
CT: control target
= control target key end

     0   :  { %7 = vsyncpa [#allocation4], 0  ;;  %s964_s9 = smov 0   ;;  %s1346_s0 = inlined_call_operand.vmem [shape: f32[512,4], index: 0, kind: input, shape index: {}]   ;;  %s1347_s1 = inlined_call_operand.vmem [shape: s32[512,1], index: 1, kind: input, shape index: {}]   ;;  %s1348_s2 = inlined_call_operand.hbm [shape: f32[1,1], index: 2, kind: output, shape index: {}]  }
   0x1 LB: > { %s970_s10 = sadd.s32 4294967295, %s943_s9   ;;  %p772_p0 = scmp.ge.s32.totalorder %s943_s9, 1  ;;  %s943_s9 = sphi %s964_s9, %s13_s9  }
   0x2   : > { %p120_p1 = scmp.lt.s32.totalorder %s943_s9, 5 }
   0x4   : > { %p121_p2 = pnand %p772_p0, %p120_p1 }
   0x5   : > { %s773_s11 = sshll.u32 (!%p121_p2), %s970_s10, 4  ;;  %p809_p4 = scmp.eq.s32.totalorder (!%p121_p2), %s970_s10, 0 }
   0x6   : > { %124 = sbr.rel (%p121_p2) target bundleno = 635 (0x27b), region = 28  ;;  %p143_p3 = scmp.lt.s32.totalorder (!%p121_p2), %s773_s11, 63 }
   0x7   : > { %s947_s19 = smov (!%p121_p2), 0.0   ;;  %p810_p5 = scmp.eq.s32.totalorder (!%p121_p2), %s970_s10, 3 }
   0x8   : > { %s948_s24 = smov (!%p121_p2), [#allocation3]  }
   0xb   : > { %v945_v0 = vmov 0   ;;  %s1350_s11 = smov (!%p143_p3, %s773_s11), 63  ;;  %vm290_vm0 = vcmask 31744   ;;  %802 = sst [smem:[#allocation2]] (%p809_p4), %s947_s19 }
   0xc   : > { %826 = vset.pattern.permute.xlu1 %v945_v0  ;;  %825 = vset.pattern.permute.xlu0 %v945_v0  ;;  %s774_s12 = sshll.u32 %s1350_s11, 3  ;;  %s659_s20 = sld [smem:[#allocation2]] }
   0xd   : > { %s983_s15 = scalar_lea.vmem %s1346_s0, %s774_s12  ;;  %s1070_s18 = scalar_lea.vmem %s1347_s1, %s774_s12 }
   0xe   : > { %v986_v1 = vld [vmem:[%s983_s15 + $0x10] sm:$0xff]  ;;  %v989_v2 = vld [vmem:[%s983_s15] sm:$0xff]  ;;  %v992_v3 = vld [vmem:[%s983_s15 + $0x18] sm:$0xff] }
   0xf   : > { %v297_v4 = vsel %vm290_vm0, %v986_v1, -inf  ;;  %v291_v5 = vsel %vm290_vm0, %v989_v2, -inf  ;;  %v999_v6 = vld [vmem:[%s983_s15 + $0x8] sm:$0xff]  ;;  %v300_v7 = vsel %vm290_vm0, %v992_v3, -inf  ;;  %v1009_v10 = vld [vmem:[%s983_s15 + $0x20] sm:$0xff]  ;;  %v1016_v13 = vld [vmem:[%s983_s15 + $0x38] sm:$0xff] }
  0x10   : > { %298 = vmax.xlane.f32.xlu1 %v297_v4  ;;  %292 = vmax.xlane.f32.xlu0 %v291_v5  ;;  %v294_v8 = vsel %vm290_vm0, %v999_v6, -inf  ;;  %v1006_v9 = vld [vmem:[%s983_s15 + $0x28] sm:$0xff]  ;;  %v303_v12 = vsel %vm290_vm0, %v1009_v10, -inf  ;;  %v1019_v14 = vld [vmem:[%s983_s15 + $0x30] sm:$0xff]  ;;  %v312_v15 = vsel %vm290_vm0, %v1016_v13, -inf  ;;  %v1029_v18 = vld [vmem:[%s983_s15 + $0x40] sm:$0xff]  ;;  %v192_v4 = vlaneseq }
  0x11   : > { %v306_v11 = vsel %vm290_vm0, %v1006_v9, -inf  ;;  %v309_v16 = vsel %vm290_vm0, %v1019_v14, -inf  ;;  %v1026_v17 = vld [vmem:[%s983_s15 + $0x48] sm:$0xff]  ;;  %v315_v20 = vsel %vm290_vm0, %v1029_v18, -inf  ;;  %v1036_v21 = vld [vmem:[%s983_s15 + $0x58] sm:$0xff]  ;;  %v1039_v22 = vld [vmem:[%s983_s15 + $0x50] sm:$0xff] }
  0x12   : > { %v318_v19 = vsel %vm290_vm0, %v1026_v17, -inf  ;;  %v324_v23 = vsel %vm290_vm0, %v1036_v21, -inf  ;;  %v321_v24 = vsel %vm290_vm0, %v1039_v22, -inf  ;;  %v1046_v25 = vld [vmem:[%s983_s15 + $0x68] sm:$0xff]  ;;  %v1049_v26 = vld [vmem:[%s983_s15 + $0x60] sm:$0xff]  ;;  %v1056_v29 = vld [vmem:[%s983_s15 + $0x78] sm:$0xff] }
  0x13   : > { %v330_v27 = vsel %vm290_vm0, %v1046_v25, -inf  ;;  %v327_v28 = vsel %vm290_vm0, %v1049_v26, -inf  ;;  %v1059_v30 = vld [vmem:[%s983_s15 + $0x70] sm:$0xff]  ;;  %v336_v31 = vsel %vm290_vm0, %v1056_v29, -inf  ;;  %v177_v33 = vld [vmem:[%s1070_s18 + $0x8] sm:$0xff]  ;;  %v176_v35 = vld [vmem:[%s1070_s18] sm:$0xff] }
  0x14   : > { %301 = vmax.xlane.f32.xlu1 %v300_v7  ;;  %295 = vmax.xlane.f32.xlu0 %v294_v8  ;;  %v333_v32 = vsel %vm290_vm0, %v1059_v30, -inf  ;;  %v178_v34 = vld [vmem:[%s1070_s18 + $0x10] sm:$0xff]  ;;  %v179_v36 = vld [vmem:[%s1070_s18 + $0x18] sm:$0xff]  ;;  %v185_v37 = vld [vmem:[%s1070_s18 + $0x48] sm:$0xff] }
  0x15   : > { %v180_v38 = vld [vmem:[%s1070_s18 + $0x20] sm:$0xff]  ;;  %v187_v39 = vld [vmem:[%s1070_s18 + $0x58] sm:$0xff]  ;;  %v181_v40 = vld [vmem:[%s1070_s18 + $0x28] sm:$0xff] }
  0x16   : > { %v189_v41 = vld [vmem:[%s1070_s18 + $0x68] sm:$0xff]  ;;  %v182_v42 = vld [vmem:[%s1070_s18 + $0x30] sm:$0xff]  ;;  %v191_v43 = vld [vmem:[%s1070_s18 + $0x78] sm:$0xff] }
  0x17   : > { %v183_v44 = vld [vmem:[%s1070_s18 + $0x38] sm:$0xff]  ;;  %v184_v45 = vld [vmem:[%s1070_s18 + $0x40] sm:$0xff]  ;;  %v186_v46 = vld [vmem:[%s1070_s18 + $0x50] sm:$0xff] }
  0x18   : > { %307 = vmax.xlane.f32.xlu1 %v306_v11  ;;  %304 = vmax.xlane.f32.xlu0 %v303_v12  ;;  %v188_v47 = vld [vmem:[%s1070_s18 + $0x60] sm:$0xff]  ;;  %v190_v48 = vld [vmem:[%s1070_s18 + $0x70] sm:$0xff] }
  0x1c   : > { %313 = vmax.xlane.f32.xlu1 %v312_v15  ;;  %310 = vmax.xlane.f32.xlu0 %v309_v16  ;;  %v1126_v15 = vand.u32 127, %v192_v4 }
  0x20   : > { %319 = vmax.xlane.f32.xlu1 %v318_v19  ;;  %316 = vmax.xlane.f32.xlu0 %v315_v20 }
  0x24   : > { %325 = vmax.xlane.f32.xlu1 %v324_v23  ;;  %322 = vmax.xlane.f32.xlu0 %v321_v24 }
  0x28   : > { %331 = vmax.xlane.f32.xlu1 %v330_v27  ;;  %328 = vmax.xlane.f32.xlu0 %v327_v28  ;;  %v946_v28 = vmov 0.0  }
  0x2c   : > { %337 = vmax.xlane.f32.xlu1 %v336_v31  ;;  %334 = vmax.xlane.f32.xlu0 %v333_v32 }
  0x3d   : > { %198 = vperm.xlu1 %826, %v177_v33  }
  0x41   : > { %201 = vperm.xlu1 %826, %v178_v34  }
  0x42   : > { %195 = vperm.xlu0 %825, %v176_v35  }
  0x45   : > { %204 = vperm.xlu1 %826, %v179_v36  }
  0x46   : > { %222 = vperm.xlu0 %825, %v185_v37  }
  0x49   : > { %207 = vperm.xlu1 %826, %v180_v38  }
  0x4a   : > { %228 = vperm.xlu0 %825, %v187_v39  }
  0x4d   : > { %210 = vperm.xlu1 %826, %v181_v40  }
  0x4e   : > { %234 = vperm.xlu0 %825, %v189_v41  }
  0x51   : > { %213 = vperm.xlu1 %826, %v182_v42  }
  0x52   : > { %240 = vperm.xlu0 %825, %v191_v43  }
  0x55   : > { %216 = vperm.xlu1 %826, %v183_v44  }
  0x59   : > { %219 = vperm.xlu1 %826, %v184_v45  }
  0x5d   : > { %225 = vperm.xlu1 %826, %v186_v46  }
  0x61   : > { %231 = vperm.xlu1 %826, %v188_v47  }
  0x65   : > { %237 = vperm.xlu1 %826, %v190_v48  }
  0x99   : > { %v1088_v49 = vpop.xlane.xlu1 %298  ;;  %v1090_v50 = vpop.xlane.xlu0 %292 }
  0x9a   : > { %v339_v59 = vsub.f32 %v989_v2, %v1090_v50  ;;  %v341_v16 = vsub.f32 %v986_v1, %v1088_v49 }
  0x9c   : > { %v355_v62 = vmul.f32 1.442695, %v339_v59  ;;  %v359_v32 = vmul.f32 1.442695, %v341_v16 }
  0x9d   : > { %v1092_v51 = vpop.xlane.xlu1 %301  ;;  %v1094_v52 = vpop.xlane.xlu0 %295 }
  0x9e   : > { %v342_v0 = vsub.f32 %v992_v3, %v1092_v51  ;;  %827 = vpow2.f32 %v355_v62  ;;  %v340_v7 = vsub.f32 %v999_v6, %v1094_v52 }
  0xa0   : > { %v361_v11 = vmul.f32 1.442695, %v342_v0  ;;  %v357_v19 = vmul.f32 1.442695, %v340_v7 }
  0xa1   : > { %v1096_v53 = vpop.xlane.xlu1 %307  ;;  %v1098_v54 = vpop.xlane.xlu0 %304 }
  0xa2   : > { %v344_v12 = vsub.f32 %v1006_v9, %v1096_v53  ;;  %829 = vpow2.f32 %v361_v11  ;;  %v343_v34 = vsub.f32 %v1009_v10, %v1098_v54 }
  0xa3   : > { %831 = vpow2.f32 %v357_v19 }
  0xa4   : > { %v365_v27 = vmul.f32 1.442695, %v344_v12  ;;  %v363_v43 = vmul.f32 1.442695, %v343_v34 }
  0xa5   : > { %v1100_v55 = vpop.xlane.xlu1 %313  ;;  %v1102_v56 = vpop.xlane.xlu0 %310 }
  0xa6   : > { %v346_v20 = vsub.f32 %v1016_v13, %v1100_v55  ;;  %833 = vpow2.f32 %v365_v27  ;;  %v345_v44 = vsub.f32 %v1019_v14, %v1102_v56 }
  0xa7   : > { %835 = vpow2.f32 %v359_v32 }
  0xa8   : > { %v369_v35 = vmul.f32 1.442695, %v346_v20  ;;  %v367_v7 = vmul.f32 1.442695, %v345_v44 }
  0xa9   : > { %v1104_v57 = vpop.xlane.xlu1 %319  ;;  %v1106_v58 = vpop.xlane.xlu0 %316 }
  0xaa   : > { %v348_v36 = vsub.f32 %v1026_v17, %v1104_v57  ;;  %837 = vpow2.f32 %v369_v35  ;;  %v347_v0 = vsub.f32 %v1029_v18, %v1106_v58 }
  0xab   : > { %v828_v48 = vpop.eup %827  ;;  %839 = vpow2.f32 %v363_v43 }
  0xac   : > { %v373_v45 = vmul.f32 1.442695, %v348_v36  ;;  %v387_v19 = vsel %vm290_vm0, %v828_v48, 0.0 }
  0xad   : > { %v1110_v60 = vpop.xlane.xlu1 %325  ;;  %v1112_v61 = vpop.xlane.xlu0 %322 }
  0xae   : > { %v349_v59 = vsub.f32 %v1039_v22, %v1112_v61  ;;  %v350_v11 = vsub.f32 %v1036_v21, %v1110_v60  ;;  %841 = vpow2.f32 %v373_v45 }
  0xaf   : > { %v830_v27 = vpop.eup %829  ;;  %843 = vpow2.f32 %v367_v7 }
  0xb0   : > { %v375_v20 = vmul.f32 1.442695, %v349_v59  ;;  %v832_v36 = vpop.eup %831 }
  0xb1   : > { %v1114_v63 = vpop.xlane.xlu1 %331  ;;  %v1118_v5 = vpop.xlane.xlu0 %328 }
  0xb2   : > { %845 = vpow2.f32 %v375_v20  ;;  %v352_v43 = vsub.f32 %v1046_v25, %v1114_v63 }
  0xb5   : > { %v1122_v8 = vpop.xlane.xlu1 %337  ;;  %v1132_v23 = vpop.xlane.xlu0 %334 }
  0xb9   : > { %v199_v24 = vpop.permute.xlu1 %198 }
  0xba   : > { %vm243_vm1 = vcmp.eq.s32.totalorder %v1126_v15, %v199_v24 }
  0xbb   : > { %v779_v31 = vsel %vm243_vm1, 1.0, %v946_v28 }
  0xbc   : > { %v468_v33 = vmul.f32 %v779_v31, %v999_v6 }
  0xbd   : > { %v202_v37 = vpop.permute.xlu1 %201  ;;  %v196_v38 = vpop.permute.xlu0 %195 }
  0xbe   : > { %vm244_vm2 = vcmp.eq.s32.totalorder %v1126_v15, %v202_v37  ;;  %vm242_vm3 = vcmp.eq.s32.totalorder %v1126_v15, %v196_v38  ;;  %v486_v39 = vsel %vm290_vm0, %v468_v33, 0.0  ;;  %v377_v33 = vmul.f32 1.442695, %v350_v11 }
  0xbf   : > { %v780_v40 = vsel %vm244_vm2, 1.0, %v946_v28  ;;  %v778_v6 = vsel %vm242_vm3, 1.0, %v946_v28  ;;  %487 = vadd.xlane.f32.xlu0 %v486_v39  ;;  %v351_v37 = vsub.f32 %v1049_v26, %v1118_v5  ;;  %v396_v39 = vsel %vm290_vm0, %v830_v27, 0.0 }
  0xc0   : > { %v469_v41 = vmul.f32 %v780_v40, %v986_v1  ;;  %v467_v42 = vmul.f32 %v778_v6, %v989_v2  ;;  %v834_v40 = vpop.eup %833 }
  0xc1   : > { %v205_v46 = vpop.permute.xlu1 %204  ;;  %v1150_v47 = vpop.permute.xlu0 %222  ;;  %v379_v44 = vmul.f32 1.442695, %v351_v37  ;;  %v402_v45 = vsel %vm290_vm0, %v834_v40, 0.0 }
  0xc2   : > { %vm245_vm4 = vcmp.eq.s32.totalorder %v1126_v15, %v205_v46  ;;  %v489_v62 = vsel %vm290_vm0, %v469_v41, 0.0  ;;  %v483_v1 = vsel %vm290_vm0, %v467_v42, 0.0  ;;  %v836_v6 = vpop.eup %835  ;;  %v390_v41 = vsel %vm290_vm0, %v832_v36, 0.0 }
  0xc3   : > { %v781_v2 = vsel %vm245_vm4, 1.0, %v946_v28  ;;  %490 = vadd.xlane.f32.xlu0 %v489_v62  ;;  %484 = vadd.xlane.f32.xlu1 %v483_v1  ;;  %v838_v42 = vpop.eup %837  ;;  %v393_v59 = vsel %vm290_vm0, %v836_v6, 0.0  ;;  %v381_v1 = vmul.f32 1.442695, %v352_v43  ;;  %vm251_vm11 = vcmp.eq.s32.totalorder %v1126_v15, %v1150_v47 }
  0xc4   : > { %v470_v4 = vmul.f32 %v781_v2, %v992_v3  ;;  %v371_v3 = vmul.f32 1.442695, %v347_v0  ;;  %v840_v62 = vpop.eup %839  ;;  %v353_v2 = vsub.f32 %v1059_v30, %v1132_v23  ;;  %v408_v0 = vsel %vm290_vm0, %v838_v42, 0.0 }
  0xc5   : > { %v208_v12 = vpop.permute.xlu1 %207  ;;  %v1163_v16 = vpop.permute.xlu0 %228  ;;  %v399_v11 = vsel %vm290_vm0, %v840_v62, 0.0 }
  0xc6   : > { %vm246_vm5 = vcmp.eq.s32.totalorder %v1126_v15, %v208_v12  ;;  %v492_v24 = vsel %vm290_vm0, %v470_v4, 0.0  ;;  %847 = vpow2.f32 %v371_v3  ;;  %v842_v4 = vpop.eup %841  ;;  %v383_v20 = vmul.f32 1.442695, %v353_v2 }
  0xc7   : > { %v782_v31 = vsel %vm246_vm5, 1.0, %v946_v28  ;;  %493 = vadd.xlane.f32.xlu0 %v492_v24  ;;  %388 = vadd.xlane.f32.xlu1 %v387_v19  ;;  %849 = vpow2.f32 %v377_v33  ;;  %v844_v12 = vpop.eup %843  ;;  %v354_v19 = vsub.f32 %v1056_v29, %v1122_v8  ;;  %v414_v24 = vsel %vm290_vm0, %v842_v4, 0.0 }
  0xc8   : > { %v471_v32 = vmul.f32 %v782_v31, %v1009_v10  ;;  %851 = vpow2.f32 %v379_v44  ;;  %v846_v27 = vpop.eup %845  ;;  %v405_v33 = vsel %vm290_vm0, %v844_v12, 0.0  ;;  %vm253_vm13 = vcmp.eq.s32.totalorder %v1126_v15, %v1163_v16 }
  0xc9   : > { %v211_v34 = vpop.permute.xlu1 %210  ;;  %v1170_v35 = vpop.permute.xlu0 %234  ;;  %853 = vpow2.f32 %v381_v1  ;;  %v417_v36 = vsel %vm290_vm0, %v846_v27, 0.0  ;;  %v789_v27 = vsel %vm253_vm13, 1.0, %v946_v28 }
  0xca   : > { %v495_v38 = vsel %vm290_vm0, %v471_v32, 0.0  ;;  %vm247_vm7 = vcmp.eq.s32.totalorder %v1126_v15, %v211_v34  ;;  %v385_v32 = vmul.f32 1.442695, %v354_v19  ;;  %855 = vpow2.f32 %v383_v20 }
  0xcb   : > { %496 = vadd.xlane.f32.xlu0 %v495_v38  ;;  %397 = vadd.xlane.f32.xlu1 %v396_v39  ;;  %v783_v37 = vsel %vm247_vm7, 1.0, %v946_v28  ;;  %vm255_vm15 = vcmp.eq.s32.totalorder %v1126_v15, %v1170_v35 }
  0xcc   : > { %857 = vpow2.f32 %v385_v32  ;;  %v472_v40 = vmul.f32 %v783_v37, %v1006_v9 }
  0xcd   : > { %v241_v10 = vpop.permute.xlu0 %240  ;;  %v214_v46 = vpop.permute.xlu1 %213 }
  0xce   : > { %vm257_vm6 = vcmp.eq.s32.totalorder %v1126_v15, %v241_v10  ;;  %vm248_vm8 = vcmp.eq.s32.totalorder %v1126_v15, %v214_v46  ;;  %v498_v42 = vsel %vm290_vm0, %v472_v40, 0.0 }
  0xcf   : > { %v1182_v48 = vsel %vm257_vm6, 1.0, %v946_v28  ;;  %391 = vadd.xlane.f32.xlu0 %v390_v41  ;;  %403 = vadd.xlane.f32.xlu1 %v402_v45  ;;  %v784_v10 = vsel %vm248_vm8, 1.0, %v946_v28 }
  0xd0   : > { %v473_v44 = vmul.f32 %v784_v10, %v1019_v14 }
  0xd1   : > { %v217_v7 = vpop.permute.xlu1 %216 }
  0xd2   : > { %vm249_vm9 = vcmp.eq.s32.totalorder %v1126_v15, %v217_v7  ;;  %v501_v9 = vsel %vm290_vm0, %v473_v44, 0.0 }
  0xd3   : > { %394 = vadd.xlane.f32.xlu0 %v393_v59  ;;  %409 = vadd.xlane.f32.xlu1 %v408_v0  ;;  %v848_v31 = vpop.eup %847  ;;  %v785_v46 = vsel %vm249_vm9, 1.0, %v946_v28 }
  0xd4   : > { %v850_v3 = vpop.eup %849  ;;  %v411_v39 = vsel %vm290_vm0, %v848_v31, 0.0  ;;  %v474_v62 = vmul.f32 %v785_v46, %v1016_v13  ;;  %v787_v13 = vsel %vm251_vm11, 1.0, %v946_v28 }
  0xd5   : > { %v220_v38 = vpop.permute.xlu1 %219  ;;  %v420_v34 = vsel %vm290_vm0, %v850_v3, 0.0  ;;  %v852_v6 = vpop.eup %851 }
  0xd6   : > { %v423_v43 = vsel %vm290_vm0, %v852_v6, 0.0  ;;  %v854_v45 = vpop.eup %853  ;;  %vm250_vm10 = vcmp.eq.s32.totalorder %v1126_v15, %v220_v38  ;;  %v504_v14 = vsel %vm290_vm0, %v474_v62, 0.0  ;;  %v482_v38 = vmul.f32 %v1182_v48, %v1056_v29 }
  0xd7   : > { %400 = vadd.xlane.f32.xlu0 %v399_v11  ;;  %415 = vadd.xlane.f32.xlu1 %v414_v24  ;;  %v426_v59 = vsel %vm290_vm0, %v854_v45, 0.0  ;;  %v856_v1 = vpop.eup %855  ;;  %v786_v2 = vsel %vm250_vm10, 1.0, %v946_v28 }
  0xd8   : > { %v429_v4 = vsel %vm290_vm0, %v856_v1, 0.0  ;;  %v475_v7 = vmul.f32 %v786_v2, %v1029_v18  ;;  %v476_v18 = vmul.f32 %v787_v13, %v1026_v17  ;;  %v791_v17 = vsel %vm255_vm15, 1.0, %v946_v28 }
  0xd9   : > { %v226_v41 = vpop.permute.xlu1 %225  ;;  %v858_v11 = vpop.eup %857  ;;  %v480_v37 = vmul.f32 %v791_v17, %v1046_v25 }
  0xda   : > { %vm252_vm12 = vcmp.eq.s32.totalorder %v1126_v15, %v226_v41  ;;  %v507_v19 = vsel %vm290_vm0, %v475_v7, 0.0  ;;  %v432_v20 = vsel %vm290_vm0, %v858_v11, 0.0  ;;  %v510_v3 = vsel %vm290_vm0, %v476_v18, 0.0 }
  0xdb   : > { %406 = vadd.xlane.f32.xlu0 %v405_v33  ;;  %418 = vadd.xlane.f32.xlu1 %v417_v36  ;;  %v788_v12 = vsel %vm252_vm12, 1.0, %v946_v28 }
  0xdc   : > { %v477_v24 = vmul.f32 %v788_v12, %v1039_v22  ;;  %v478_v22 = vmul.f32 %v789_v27, %v1036_v21  ;;  %v522_v21 = vsel %vm290_vm0, %v480_v37, 0.0 }
  0xdd   : > { %v232_v0 = vpop.permute.xlu1 %231 }
  0xde   : > { %vm254_vm14 = vcmp.eq.s32.totalorder %v1126_v15, %v232_v0  ;;  %v513_v16 = vsel %vm290_vm0, %v477_v24, 0.0  ;;  %v516_v35 = vsel %vm290_vm0, %v478_v22, 0.0 }
  0xdf   : > { %412 = vadd.xlane.f32.xlu0 %v411_v39  ;;  %421 = vadd.xlane.f32.xlu1 %v420_v34  ;;  %v790_v31 = vsel %vm254_vm14, 1.0, %v946_v28 }
  0xe0   : > { %v479_v32 = vmul.f32 %v790_v31, %v1049_v26 }
  0xe1   : > { %v238_v47 = vpop.permute.xlu1 %237 }
  0xe2   : > { %vm256_vm1 = vcmp.eq.s32.totalorder %v1126_v15, %v238_v47  ;;  %v519_v36 = vsel %vm290_vm0, %v479_v32, 0.0 }
  0xe3   : > { %499 = vadd.xlane.f32.xlu0 %v498_v42  ;;  %424 = vadd.xlane.f32.xlu1 %v423_v43  ;;  %v792_v33 = vsel %vm256_vm1, 1.0, %v946_v28  ;;  %v528_v28 = vsel %vm290_vm0, %v482_v38, 0.0 }
  0xe4   : > { %v481_v15 = vmul.f32 %v792_v33, %v1059_v30 }
  0xe6   : > { %v525_v26 = vsel %vm290_vm0, %v481_v15, 0.0  ;;  %vm660_vm0 = vcmask 7168  }
  0xe7   : > { %502 = vadd.xlane.f32.xlu0 %v501_v9  ;;  %427 = vadd.xlane.f32.xlu1 %v426_v59 }
  0xeb   : > { %505 = vadd.xlane.f32.xlu0 %v504_v14  ;;  %430 = vadd.xlane.f32.xlu1 %v429_v4 }
  0xef   : > { %508 = vadd.xlane.f32.xlu0 %v507_v19  ;;  %433 = vadd.xlane.f32.xlu1 %v432_v20 }
  0xf3   : > { %514 = vadd.xlane.f32.xlu0 %v513_v16  ;;  %511 = vadd.xlane.f32.xlu1 %v510_v3 }
  0xf7   : > { %520 = vadd.xlane.f32.xlu0 %v519_v36  ;;  %517 = vadd.xlane.f32.xlu1 %v516_v35 }
  0xfb   : > { %526 = vadd.xlane.f32.xlu0 %v525_v26  ;;  %523 = vadd.xlane.f32.xlu1 %v522_v21 }
  0xff   : > { %529 = vadd.xlane.f32.xlu1 %v528_v28 }
 0x148   : > { %v488_v39 = vpop.xlane.xlu0 %487 }
 0x149   : > { %v532_v13 = vsub.f32 %v488_v39, %v1094_v52 }
 0x14c   : > { %v485_v34 = vpop.xlane.xlu1 %484  ;;  %v491_v40 = vpop.xlane.xlu0 %490 }
 0x14d   : > { %v531_v48 = vsub.f32 %v485_v34, %v1090_v50  ;;  %v533_v18 = vsub.f32 %v491_v40, %v1088_v49 }
 0x150   : > { %v389_v30 = vpop.xlane.xlu1 %388  ;;  %v494_v6 = vpop.xlane.xlu0 %493 }
 0x151   : > { %859 = vlog2.f32 %v389_v30  ;;  %v534_v2 = vsub.f32 %v494_v6, %v1092_v51 }
 0x154   : > { %v398_v25 = vpop.xlane.xlu1 %397  ;;  %v497_v10 = vpop.xlane.xlu0 %496 }
 0x155   : > { %861 = vlog2.f32 %v398_v25  ;;  %v535_v36 = vsub.f32 %v497_v10, %v1098_v54 }
 0x158   : > { %v404_v41 = vpop.xlane.xlu1 %403  ;;  %v392_v42 = vpop.xlane.xlu0 %391 }
 0x159   : > { %863 = vlog2.f32 %v392_v42 }
 0x15a   : > { %865 = vlog2.f32 %v404_v41 }
 0x15c   : > { %v410_v43 = vpop.xlane.xlu1 %409  ;;  %v395_v44 = vpop.xlane.xlu0 %394 }
 0x15d   : > { %867 = vlog2.f32 %v395_v44 }
 0x15e   : > { %v860_v29 = vpop.eup %859 }
 0x15f   : > { %v436_v45 = vmul.f32 0.6931472, %v860_v29 }
 0x160   : > { %v416_v46 = vpop.xlane.xlu1 %415  ;;  %v401_v9 = vpop.xlane.xlu0 %400 }
 0x161   : > { %v1247_v59 = vsub.f32 %v531_v48, %v436_v45  ;;  %869 = vlog2.f32 %v401_v9 }
 0x162   : > { %v862_v62 = vpop.eup %861  ;;  %871 = vlog2.f32 %v410_v43 }
 0x163   : > { %v563_v1 = vmul.f32 1.442695, %v1247_v59  ;;  %v442_v0 = vmul.f32 0.6931472, %v862_v62 }
 0x164   : > { %v419_v14 = vpop.xlane.xlu1 %418  ;;  %v407_v4 = vpop.xlane.xlu0 %406 }
 0x165   : > { %873 = vpow2.f32 %v563_v1  ;;  %v1251_v7 = vsub.f32 %v534_v2, %v442_v0 }
 0x166   : > { %v864_v11 = vpop.eup %863  ;;  %875 = vlog2.f32 %v407_v4 }
 0x167   : > { %v569_v50 = vmul.f32 1.442695, %v1251_v7  ;;  %v438_v12 = vmul.f32 0.6931472, %v864_v11  ;;  %v866_v20 = vpop.eup %865 }
 0x168   : > { %v422_v47 = vpop.xlane.xlu1 %421  ;;  %v413_v19 = vpop.xlane.xlu0 %412  ;;  %v446_v32 = vmul.f32 0.6931472, %v866_v20 }
 0x169   : > { %877 = vpow2.f32 %v569_v50  ;;  %v1255_v24 = vsub.f32 %v532_v13, %v438_v12 }
 0x16a   : > { %v868_v51 = vpop.eup %867  ;;  %879 = vlog2.f32 %v413_v19 }
 0x16b   : > { %v565_v27 = vmul.f32 1.442695, %v1255_v24  ;;  %v440_v31 = vmul.f32 0.6931472, %v868_v51  ;;  %881 = vlog2.f32 %v416_v46 }
 0x16c   : > { %v425_v16 = vpop.xlane.xlu1 %424  ;;  %v500_v3 = vpop.xlane.xlu0 %499  ;;  %883 = vlog2.f32 %v419_v14 }
 0x16d   : > { %v536_v52 = vsub.f32 %v500_v3, %v1096_v53  ;;  %885 = vpow2.f32 %v565_v27  ;;  %v1260_v22 = vsub.f32 %v533_v18, %v440_v31 }
 0x16e   : > { %v870_v17 = vpop.eup %869  ;;  %887 = vlog2.f32 %v422_v47 }
 0x16f   : > { %v1262_v33 = vsub.f32 %v536_v52, %v446_v32  ;;  %v567_v49 = vmul.f32 1.442695, %v1260_v22  ;;  %v444_v35 = vmul.f32 0.6931472, %v870_v17  ;;  %v872_v26 = vpop.eup %871  ;;  %889 = vlog2.f32 %v425_v16 }
 0x170   : > { %v428_v15 = vpop.xlane.xlu1 %427  ;;  %v503_v37 = vpop.xlane.xlu0 %502  ;;  %v450_v34 = vmul.f32 0.6931472, %v872_v26 }
 0x171   : > { %v573_v21 = vmul.f32 1.442695, %v1262_v33  ;;  %891 = vpow2.f32 %v567_v49  ;;  %v1267_v53 = vsub.f32 %v535_v36, %v444_v35  ;;  %v537_v10 = vsub.f32 %v503_v37, %v1102_v56 }
 0x172   : > { %v874_v38 = vpop.eup %873 }
 0x173   : > { %v595_v28 = vsub.f32 1.0, %v874_v38  ;;  %893 = vpow2.f32 %v573_v21  ;;  %v876_v39 = vpop.eup %875  ;;  %v571_v40 = vmul.f32 1.442695, %v1267_v53 }
 0x174   : > { %895 = vlog2.f32 %v428_v15  ;;  %v431_v54 = vpop.xlane.xlu1 %430  ;;  %v506_v30 = vpop.xlane.xlu0 %505  ;;  %v448_v25 = vmul.f32 0.6931472, %v876_v39 }
 0x175   : > { %v611_v6 = vmul.f32 %v595_v28, %v595_v28  ;;  %v538_v41 = vsub.f32 %v506_v30, %v1100_v55  ;;  %897 = vpow2.f32 %v571_v40 }
 0x176   : > { %v878_v42 = vpop.eup %877  ;;  %v1272_v44 = vsub.f32 %v537_v10, %v448_v25  ;;  %899 = vlog2.f32 %v431_v54 }
 0x177   : > { %v598_v43 = vsub.f32 1.0, %v878_v42  ;;  %v1274_v29 = vsub.f32 %v538_v41, %v450_v34  ;;  %v880_v48 = vpop.eup %879  ;;  %v627_v45 = vmul.f32 %v611_v6, %v1247_v59 }
 0x178   : > { %v434_v46 = vpop.xlane.xlu1 %433  ;;  %v509_v9 = vpop.xlane.xlu0 %508  ;;  %v575_v1 = vmul.f32 1.442695, %v1272_v44  ;;  %v452_v56 = vmul.f32 0.6931472, %v880_v48 }
 0x179   : > { %v882_v62 = vpop.eup %881  ;;  %v577_v55 = vmul.f32 1.442695, %v1274_v29  ;;  %901 = vlog2.f32 %v434_v46  ;;  %v539_v0 = vsub.f32 %v509_v9, %v1106_v58  ;;  %v614_v4 = vmul.f32 %v598_v43, %v598_v43 }
 0x17a   : > { %v884_v2 = vpop.eup %883  ;;  %903 = vpow2.f32 %v575_v1  ;;  %v643_v50 = vsub.f32 0.0, %v627_v45  ;;  %v454_v19 = vmul.f32 0.6931472, %v882_v62 }
 0x17b   : > { %v886_v14 = vpop.eup %885  ;;  %905 = vpow2.f32 %v577_v55  ;;  %v1280_v13 = vsub.f32 %v539_v0, %v452_v56  ;;  %v456_v20 = vmul.f32 0.6931472, %v884_v2  ;;  %v630_v3 = vmul.f32 %v614_v4, %v1251_v7 }
 0x17c   : > { %v888_v11 = vpop.eup %887  ;;  %v596_v59 = vsub.f32 1.0, %v886_v14  ;;  %v512_v12 = vpop.xlane.xlu1 %511  ;;  %v661_v49 = vsel %vm660_vm0, %v643_v50, 0.0 }
 0x17d   : > { %v515_v47 = vpop.xlane.xlu0 %514  ;;  %v540_v51 = vsub.f32 %v512_v12, %v1104_v57  ;;  %v890_v27 = vpop.eup %889  ;;  %v579_v31 = vmul.f32 1.442695, %v1280_v13  ;;  %v458_v32 = vmul.f32 0.6931472, %v888_v11  ;;  %v646_v30 = vsub.f32 0.0, %v630_v3 }
 0x17e   : > { %v541_v18 = vsub.f32 %v515_v47, %v1112_v61  ;;  %v612_v58 = vmul.f32 %v596_v59, %v596_v59  ;;  %v892_v16 = vpop.eup %891  ;;  %v460_v34 = vmul.f32 0.6931472, %v890_v27 }
 0x17f   : > { %v1286_v52 = vsub.f32 %v540_v51, %v454_v19  ;;  %v597_v57 = vsub.f32 1.0, %v892_v16  ;;  %907 = vpow2.f32 %v579_v31 }
 0x180   : > { %v1288_v17 = vsub.f32 %v541_v18, %v456_v20  ;;  %v894_v36 = vpop.eup %893  ;;  %v628_v35 = vmul.f32 %v612_v58, %v1255_v24  ;;  %v518_v61 = vpop.xlane.xlu1 %517 }
 0x181   : > { %v521_v15 = vpop.xlane.xlu0 %520  ;;  %v896_v37 = vpop.eup %895  ;;  %v600_v26 = vsub.f32 1.0, %v894_v36  ;;  %v581_v21 = vmul.f32 1.442695, %v1286_v52  ;;  %v542_v38 = vsub.f32 %v518_v61, %v1110_v60  ;;  %v613_v39 = vmul.f32 %v597_v57, %v597_v57 }
 0x182   : > { %v583_v7 = vmul.f32 1.442695, %v1288_v17  ;;  %v644_v28 = vsub.f32 0.0, %v628_v35  ;;  %v543_v40 = vsub.f32 %v521_v15, %v1118_v5  ;;  %v898_v54 = vpop.eup %897  ;;  %v462_v45 = vmul.f32 0.6931472, %v896_v37 }
 0x183   : > { %v616_v24 = vmul.f32 %v600_v26, %v600_v26  ;;  %909 = vpow2.f32 %v581_v21  ;;  %v1296_v6 = vsub.f32 %v542_v38, %v458_v32  ;;  %v629_v10 = vmul.f32 %v613_v39, %v1260_v22  ;;  %v900_v60 = vpop.eup %899 }
 0x184   : > { %v662_v25 = vsel %vm660_vm0, %v644_v28, 0.0  ;;  %v599_v41 = vsub.f32 1.0, %v898_v54  ;;  %911 = vpow2.f32 %v583_v7  ;;  %v524_v42 = vpop.xlane.xlu1 %523  ;;  %v1302_v46 = vsub.f32 %v543_v40, %v460_v34 }
 0x185   : > { %v527_v43 = vpop.xlane.xlu0 %526  ;;  %v632_v48 = vmul.f32 %v616_v24, %v1262_v33  ;;  %v585_v5 = vmul.f32 1.442695, %v1296_v6  ;;  %v645_v9 = vsub.f32 0.0, %v629_v10  ;;  %v544_v1 = vsub.f32 %v524_v42, %v1114_v63 }
 0x186   : > { %v615_v62 = vmul.f32 %v599_v41, %v599_v41  ;;  %v545_v2 = vsub.f32 %v527_v43, %v1132_v23  ;;  %v902_v56 = vpop.eup %901  ;;  %v666_v22 = vsel %vm660_vm0, %v646_v30, 0.0  ;;  %v663_v55 = vadd.f32 %v662_v25, %v661_v49 }
 0x187   : > { %913 = vpow2.f32 %v585_v5  ;;  %v587_v0 = vmul.f32 1.442695, %v1302_v46  ;;  %v904_v14 = vpop.eup %903  ;;  %v664_v33 = vsel %vm660_vm0, %v645_v9, 0.0  ;;  %v464_v11 = vmul.f32 0.6931472, %v900_v60 }
 0x188   : > { %v631_v4 = vmul.f32 %v615_v62, %v1267_v53  ;;  %v1310_v50 = vsub.f32 %v544_v1, %v462_v45  ;;  %v530_v59 = vpop.xlane.xlu1 %529  ;;  %v906_v12 = vpop.eup %905  ;;  %v665_v63 = vadd.f32 %v664_v33, %v663_v55  ;;  %v648_v47 = vsub.f32 0.0, %v632_v48 }
 0x189   : > { %v601_v23 = vsub.f32 1.0, %v904_v14  ;;  %915 = vpow2.f32 %v587_v0  ;;  %v602_v20 = vsub.f32 1.0, %v906_v12  ;;  %v1313_v18 = vsub.f32 %v545_v2, %v464_v11 }
 0x18a   : > { %v647_v19 = vsub.f32 0.0, %v631_v4  ;;  %v589_v51 = vmul.f32 1.442695, %v1310_v50  ;;  %v667_v27 = vadd.f32 %v666_v22, %v665_v63  ;;  %v466_v31 = vmul.f32 0.6931472, %v902_v56 }
 0x18b   : > { %v617_v58 = vmul.f32 %v601_v23, %v601_v23  ;;  %v546_v53 = vsub.f32 %v530_v59, %v1122_v8  ;;  %v618_v3 = vmul.f32 %v602_v20, %v602_v20  ;;  %v591_v32 = vmul.f32 1.442695, %v1313_v18 }
 0x18c   : > { %v668_v16 = vsel %vm660_vm0, %v647_v19, 0.0  ;;  %917 = vpow2.f32 %v589_v51  ;;  %v908_v36 = vpop.eup %907  ;;  %v670_v61 = vsel %vm660_vm0, %v648_v47, 0.0 }
 0x18d   : > { %v669_v49 = vadd.f32 %v668_v16, %v667_v27  ;;  %v633_v35 = vmul.f32 %v617_v58, %v1272_v44  ;;  %v562_v57 = vsub.f32 %v546_v53, %v466_v31  ;;  %v634_v15 = vmul.f32 %v618_v3, %v1274_v29 }
 0x18e   : > { %v603_v37 = vsub.f32 1.0, %v908_v36  ;;  %919 = vpow2.f32 %v591_v32 }
 0x18f   : > { %v671_v26 = vadd.f32 %v670_v61, %v669_v49  ;;  %v649_v21 = vsub.f32 0.0, %v633_v35  ;;  %v593_v8 = vmul.f32 1.442695, %v562_v57  ;;  %v650_v38 = vsub.f32 0.0, %v634_v15 }
 0x190   : > { %v910_v7 = vpop.eup %909  ;;  %v619_v28 = vmul.f32 %v603_v37, %v603_v37 }
 0x191   : > { %v912_v39 = vpop.eup %911  ;;  %v672_v34 = vsel %vm660_vm0, %v649_v21, 0.0  ;;  %v604_v40 = vsub.f32 1.0, %v910_v7  ;;  %921 = vpow2.f32 %v593_v8  ;;  %v674_v24 = vsel %vm660_vm0, %v650_v38, 0.0 }
 0x192   : > { %v673_v54 = vadd.f32 %v672_v34, %v671_v26  ;;  %v635_v44 = vmul.f32 %v619_v28, %v1280_v13  ;;  %v605_v30 = vsub.f32 1.0, %v912_v39 }
 0x193   : > { %v620_v29 = vmul.f32 %v604_v40, %v604_v40 }
 0x194   : > { %v914_v25 = vpop.eup %913  ;;  %v651_v10 = vsub.f32 0.0, %v635_v44  ;;  %v621_v41 = vmul.f32 %v605_v30, %v605_v30  ;;  %v675_v48 = vadd.f32 %v674_v24, %v673_v54 }
 0x195   : > { %v636_v42 = vmul.f32 %v620_v29, %v1286_v52  ;;  %v606_v43 = vsub.f32 1.0, %v914_v25 }
 0x196   : > { %v916_v60 = vpop.eup %915  ;;  %v676_v45 = vsel %vm660_vm0, %v651_v10, 0.0  ;;  %v637_v5 = vmul.f32 %v621_v41, %v1288_v17 }
 0x197   : > { %v652_v9 = vsub.f32 0.0, %v636_v42  ;;  %v622_v62 = vmul.f32 %v606_v43, %v606_v43  ;;  %v607_v1 = vsub.f32 1.0, %v916_v60  ;;  %v677_v13 = vadd.f32 %v676_v45, %v675_v48 }
 0x198   : > { %v653_v2 = vsub.f32 0.0, %v637_v5 }
 0x199   : > { %v918_v56 = vpop.eup %917  ;;  %v678_v22 = vsel %vm660_vm0, %v652_v9, 0.0  ;;  %v638_v55 = vmul.f32 %v622_v62, %v1296_v6  ;;  %v623_v0 = vmul.f32 %v607_v1, %v607_v1 }
 0x19a   : > { %v679_v14 = vadd.f32 %v678_v22, %v677_v13  ;;  %v608_v52 = vsub.f32 1.0, %v918_v56  ;;  %v680_v4 = vsel %vm660_vm0, %v653_v2, 0.0 }
 0x19b   : > { %v920_v33 = vpop.eup %919  ;;  %v654_v11 = vsub.f32 0.0, %v638_v55  ;;  %v639_v59 = vmul.f32 %v623_v0, %v1302_v46 }
 0x19c   : > { %v681_v17 = vadd.f32 %v680_v4, %v679_v14  ;;  %v624_v12 = vmul.f32 %v608_v52, %v608_v52  ;;  %v609_v63 = vsub.f32 1.0, %v920_v33 }
 0x19d   : > { %v682_v47 = vsel %vm660_vm0, %v654_v11, 0.0  ;;  %v655_v23 = vsub.f32 0.0, %v639_v59 }
 0x19e   : > { %v922_v19 = vpop.eup %921  ;;  %v683_v20 = vadd.f32 %v682_v47, %v681_v17  ;;  %v640_v51 = vmul.f32 %v624_v12, %v1310_v50  ;;  %v625_v6 = vmul.f32 %v609_v63, %v609_v63 }
 0x19f   : > { %v684_v27 = vsel %vm660_vm0, %v655_v23, 0.0  ;;  %v610_v58 = vsub.f32 1.0, %v922_v19 }
 0x1a0   : > { %v656_v31 = vsub.f32 0.0, %v640_v51  ;;  %v641_v53 = vmul.f32 %v625_v6, %v1313_v18  ;;  %v685_v16 = vadd.f32 %v684_v27, %v683_v20 }
 0x1a1   : > { %v626_v46 = vmul.f32 %v610_v58, %v610_v58 }
 0x1a2   : > { %v657_v3 = vsub.f32 0.0, %v641_v53  ;;  %v686_v32 = vsel %vm660_vm0, %v656_v31, 0.0 }
 0x1a3   : > { %v642_v36 = vmul.f32 %v626_v46, %v562_v57  ;;  %v687_v49 = vadd.f32 %v686_v32, %v685_v16 }
 0x1a4   : > { %v688_v35 = vsel %vm660_vm0, %v657_v3, 0.0 }
 0x1a5   : > { %v658_v61 = vsub.f32 0.0, %v642_v36  ;;  %v689_v15 = vadd.f32 %v688_v35, %v687_v49 }
 0x1a7   : > { %v690_v50 = vsel %vm660_vm0, %v658_v61, 0.0 }
 0x1a8   : > { %v691_v37 = vadd.f32 %v690_v50, %v689_v15 }
 0x1aa   : > { %692 = vadd.xlane.f32.xlu0 %v691_v37 }
 0x233   : > { %v693_v18 = vpop.xlane.xlu0 %692 }
 0x234   : > { %v694_v26 = vrot.slane %v693_v18, 4 }
 0x236   : > { %v695_v21 = vadd.f32 %v694_v26, %v693_v18 }
 0x238   : > { %v696_v8 = vrot.slane %v695_v21, 2 }
 0x23a   : > { %v697_v7 = vadd.f32 %v696_v8, %v695_v21 }
 0x23c   : > { %v698_v38 = vrot.slane %v697_v7, 1 }
 0x23e   : > { %v699_v57 = vadd.f32 %v698_v38, %v697_v7 }
 0x240   : > { %799 = vpush %v699_v57 }
 0x271   : > { %s800_s21 = spop %799 }
 0x272   : > { %s701_s22 = sadd.f32 %s800_s21, %s659_s20 }
 0x274   : > { %703 = sst [smem:[#allocation2]] %s701_s22  ;;  %s709_s23 = smul.f32 0.001953125, %s701_s22 }
 0x276   : > { %804 = sst [smem:[#allocation3]] (%p810_p5), %s709_s23 }
 0x277   : > { %806 = dma.smem_to_hbm (%p810_p5), %s948_s24, 16, %s1348_s2, [#allocation4]  }
 0x278   : > { %938 = dma.done.wait (%p810_p5), [#allocation4], 16  }
 0x279   : > { %940 = vsyncadd (%p810_p5), [#allocation4], 4294967280 }
 0x27a   : > { %725 = sfence }
 0x27b PF: > { %s13_s9 = sadd.s32 1, %s943_s9  }
 0x27c   : > { %p10_p6 = scmp.ge.s32.totalorder %s13_s9, 6  }
 0x27e   :  { %12 = sbr.rel (!%p10_p6) target bundleno = 1 (0x1), region = 69 }
 0x283   :  { %731 = vsyncpa [#allocation4], 1 }
 0x284   :  { %733 = vsyncpa [#allocation4 + $0x1], 1 }

</bundles_post_ra>
